<compile_context>
chip_gen: v6e
topology: v6e:2x2x1
jax: 0.10.0
libtpu: 0.0.40
codegen_flags: <defaults>
</compile_context>

<pallas_src>
import functools
import math

import jax
import jax.numpy as jnp
from jax.experimental import pallas as pl
from jax.experimental.pallas import tpu as pltpu


def _head_kernel(x_ref, w_ref, b_ref, o_ref, *, n_keep, inv):
    """Fused AvgPool2d((4,1)) group-0 + freq-mean + MeanPooling 1x1 conv ('None' act).

    x_ref : (Bt, C, H*W)  backbone features, NCHW with the spatial dims collapsed;
                          the first n_keep = 4*W entries of the last axis are the 4
                          H rows that survive AvgPool group 0 -> cla[:, :, :, 0].
    w_ref : (C, Lp)       1x1-conv weight (transposed / zero-padded / maybe bf16).
    b_ref : (1, Lp)       conv bias (f32, zero-padded).
    o_ref : (Bt, Lp)      lane-dense output block (wrapper slices back to L).
    """
    x = x_ref[...].astype(jnp.float32)                 # f32 accumulation path
    hw = x.shape[-1]
    if n_keep < hw:
        # Keep only the 4 contributing H rows (rows 0..3 for every W column).
        keep = jax.lax.broadcasted_iota(jnp.int32, (1, 1, hw), 2) < n_keep
        x = jnp.where(keep, x, 0.0)
    # AvgPool (4,1) group 0 and the freq-mean are linear -> commute with the 1x1 conv:
    # pre-reduce each row to a single (C,) vector, then one MXU pass per batch tile.
    v = jnp.sum(x, axis=-1) * inv                      # (Bt, C) f32
    w = w_ref[...].astype(jnp.float32)                 # upcast bf16 weight (tiny VPU cost)
    out = jnp.dot(v, w, preferred_element_type=jnp.float32) + b_ref[...]
    o_ref[...] = out.astype(o_ref.dtype)               # cla_activation == 'None'


def audio_feature_head(features_nchw, cla_weight, cla_bias, *,
                       weight_dtype=jnp.bfloat16, b_tile=None):
    """features_nchw: (B, C, H, W) = effnet.extract_features(x.transpose(2,3)) output.
    cla_weight: (L, C, 1, 1) Conv2d weight;  cla_bias: (L,).  Returns (B, L) float32.

    weight_dtype: storage dtype for the resident conv weight (default bf16; the kernel
                  upcasts to f32 before the MXU, so only weight quantization is lost).
    b_tile      : optional batch-tile override (rounded to a multiple of 8).
    """
    B, C, H, W = features_nchw.shape
    L = cla_weight.shape[0]
    assert H >= 4, "AvgPool2d((4,1)) needs at least 4 rows on the pooled axis"

    # ---- params (tiny): weight -> (C, Lp) matmul operand, lane-dense zero padding ----
    Lp = max(128, ((L + 127) // 128) * 128)
    w = jnp.transpose(cla_weight.reshape(L, C), (1, 0))        # (C, L)
    b = cla_bias.reshape(1, L).astype(jnp.float32)
    if Lp != L:
        w = jnp.pad(w, ((0, 0), (0, Lp - L)))
        b = jnp.pad(b, ((0, 0), (0, Lp - L)))
    if weight_dtype is not None:
        w = w.astype(weight_dtype)

    # ---- feature stream: NCHW consumed directly, only a free contiguous reshape ----
    HW = H * W
    x = features_nchw.reshape(B, C, HW)

    # ---- generation-aware VMEM budget & batch-tile selection ----
    try:
        vmem_cap = int(pltpu.get_tpu_info().vmem_capacity_bytes)
    except Exception:
        vmem_cap = 64 * 1024 * 1024                 # conservative: v7x per-TC VMEM
    vmem_budget = min(vmem_cap - (8 << 20), int(vmem_cap * 0.8))

    hw_pad = ((HW + 127) // 128) * 128              # lane padding inside VMEM
    w_bytes = C * Lp * jnp.dtype(w.dtype).itemsize
    fixed = 2 * w_bytes + 2 * Lp * 4                # double-buffered resident weight+bias

    def _row_cost(isz):
        # 2 pipelined input buffers + one live f32 working copy + 2 output buffers.
        return C * hw_pad * (2 * isz + 4) + 2 * Lp * 4

    itemsize = jnp.dtype(x.dtype).itemsize
    if itemsize > 2 and fixed + 8 * _row_cost(itemsize) > vmem_budget:
        # Pathological C*H*W: even an 8-row double-buffered block misses the budget.
        # Halve the stream rather than OOM (only case where we accept a cast pass).
        # TODO(synk): a reduction grid axis over H*W with a scratch accumulator would
        # avoid this cast copy for such shapes.
        x = x.astype(jnp.bfloat16)
        itemsize = 2

    if b_tile is None:
        b_tile = (vmem_budget - fixed) // max(_row_cost(itemsize), 1)
        b_tile = max(8, min(256, (b_tile // 8) * 8))
    b_tile = max(8, (b_tile // 8) * 8)
    if B >= 16:
        # Keep >= 2 grid steps so the 1-D "parallel" grid feeds both v7x TensorCores.
        half = ((((B + 1) // 2) + 7) // 8) * 8
        b_tile = min(b_tile, max(8, half))
    if b_tile >= B:
        b_tile = B                                   # single full-batch block, no padding
    grid_b = pl.cdiv(B, b_tile)                      # partial last tile: OOB reads feed
                                                     # only discarded output rows.

    footprint = fixed + b_tile * _row_cost(itemsize)
    vmem_limit = int(min(vmem_budget, max(footprint + (8 << 20), 32 << 20)))

    kernel = functools.partial(_head_kernel, n_keep=4 * W, inv=1.0 / float(4 * W))
    out = pl.pallas_call(
        kernel,
        out_shape=jax.ShapeDtypeStruct((B, Lp), jnp.float32),
        grid_spec=pltpu.PrefetchScalarGridSpec(
            num_scalar_prefetch=0,
            grid=(grid_b,),
            in_specs=[
                # Last two block dims equal the full array dims -> (8,128)-rule safe.
                pl.BlockSpec((b_tile, C, HW), lambda i: (i, 0, 0)),
                # Constant block index -> weight/bias DMA'd once, stay resident.
                pl.BlockSpec((C, Lp), lambda i: (0, 0)),
                pl.BlockSpec((1, Lp), lambda i: (0, 0)),
            ],
            out_specs=pl.BlockSpec((b_tile, Lp), lambda i: (i, 0)),
        ),
        compiler_params=pltpu.CompilerParams(
            dimension_semantics=("parallel",),
            vmem_limit_bytes=vmem_limit),
    )(x, w, b)
    return out[:, :L]


def init_cla_params(key, n_out, n_in):
    """Deterministic re-implementation of init_layer() for the MeanPooling 1x1 conv."""
    n = n_in * 1 * 1                       # n_in * kh * kw
    std = math.sqrt(2.0 / n)
    scale = std * math.sqrt(3.0)
    w = jax.random.uniform(key, (n_out, n_in, 1, 1), jnp.float32, -scale, scale)
    b = jnp.zeros((n_out,), jnp.float32)   # bias.fill_(0.0)
    return w, b


if __name__ == "__main__":
    # TODO(synk): EfficientNet-b0 `extract_features` (external efficientnet_pytorch
    # backbone: stem conv + 16 MBConv blocks with BN/SE/swish) is not reimplemented;
    # the Pallas kernel covers the module-defined head and consumes the backbone's
    # NCHW feature map directly.
    key = jax.random.PRNGKey(0)
    k_feat, k_w = jax.random.split(key)

    # Small stand-in for the backbone output.  Real module sizes: C=1280, label_dim=527.
    B, C, H, W = 2, 256, 8, 8
    label_dim = 100   # not a multiple of 128 -> exercises the lane-dense L padding path

    features = jax.random.normal(k_feat, (B, C, H, W), jnp.float32)   # NCHW, like PyTorch
    cla_w, cla_b = init_cla_params(k_w, label_dim, C)

    # Pure-JAX reference following the exact PyTorch op order.
    pooled = jnp.mean(features.reshape(B, C, H // 4, 4, W), axis=3)    # AvgPool2d((4,1))
    pooled = jnp.transpose(pooled, (0, 1, 3, 2))                       # x.transpose(2, 3)
    cla = (jnp.einsum("bcfg,oc->bofg", pooled, cla_w.reshape(label_dim, C))
           + cla_b[None, :, None, None])                               # 1x1 conv + bias
    ref = jnp.mean(cla[:, :, :, 0], axis=2)                            # slice + mean(dim=2)

    # Full-precision weight path (tight check).
    out_f32 = audio_feature_head(features, cla_w, cla_b, weight_dtype=jnp.float32)
    out_f32 = jax.block_until_ready(out_f32)
    assert out_f32.shape == (B, label_dim)
    err_f32 = float(jnp.max(jnp.abs(out_f32 - ref)))
    assert jnp.allclose(out_f32, ref, atol=1e-4, rtol=1e-4), err_f32

    # Default path: bf16-stored weight, f32 LHS / f32 accumulation.
    out = audio_feature_head(features, cla_w, cla_b)
    out = jax.block_until_ready(out)
    assert out.shape == (B, label_dim)
    err_w = float(jnp.max(jnp.abs(out - ref)))
    assert jnp.allclose(out, ref, atol=5e-2, rtol=5e-2), err_w

    # bf16 backbone feature map (native stream dtype; kernel still accumulates in f32).
    out_bf16 = audio_feature_head(features.astype(jnp.bfloat16), cla_w, cla_b)
    out_bf16 = jax.block_until_ready(out_bf16)
    assert out_bf16.shape == (B, label_dim)
    err_x = float(jnp.max(jnp.abs(out_bf16 - ref)))
    assert jnp.allclose(out_bf16, ref, atol=5e-2, rtol=5e-2), err_x

    print("KERNEL_OK")
</pallas_src>

<mosaic_0001>
module attributes {stable_mosaic.version = 11 : i64} {
  func.func @_head_kernel(%arg0: i32, %arg1: memref<2x256x64xf32, #tpu.memory_space<vmem>>, %arg2: memref<256x128xf32, #tpu.memory_space<vmem>>, %arg3: memref<1x128xf32, #tpu.memory_space<vmem>>, %arg4: memref<2x128xf32, #tpu.memory_space<vmem>>) attributes {dimension_semantics = [#tpu.dimension_semantics<parallel>], iteration_bounds = array<i64: 1>, scalar_prefetch = 0 : i64, scratch_operands = 0 : i64, tpu.core_type = #tpu.core_type<tc>, window_params = [{transform_indices = @transform_0, window_bounds = array<i64: 2, 256, 64>}, {pipeline_mode = #tpu.pipeline_mode<synchronous>, transform_indices = @transform_1, window_bounds = array<i64: 256, 128>}, {pipeline_mode = #tpu.pipeline_mode<synchronous>, transform_indices = @transform_2, window_bounds = array<i64: 1, 128>}, {transform_indices = @transform_3, window_bounds = array<i64: 2, 128>}]} {
    %c0 = arith.constant 0 : index
    %c0_0 = arith.constant 0 : index
    %c0_1 = arith.constant 0 : index
    %0 = vector.load %arg1[%c0, %c0_0, %c0_1] : memref<2x256x64xf32, #tpu.memory_space<vmem>>, vector<2x256x64xf32>
    %1 = tpu.iota {dimensions = array<i32: 2>} : vector<1x1x64xi32>
    %c32_i32 = arith.constant 32 : i32
    %2 = vector.broadcast %c32_i32 : i32 to vector<1x1x64xi32>
    %3 = arith.cmpi slt, %1, %2 : vector<1x1x64xi32>
    %cst = arith.constant 0.000000e+00 : f32
    %4 = vector.shape_cast %3 : vector<1x1x64xi1> to vector<1x1x64xi1>
    %5 = vector.broadcast %4 : vector<1x1x64xi1> to vector<2x256x64xi1>
    %6 = vector.broadcast %cst : f32 to vector<2x256x64xf32>
    %7 = arith.select %5, %0, %6 : vector<2x256x64xi1>, vector<2x256x64xf32>
    %cst_2 = arith.constant dense<0.000000e+00> : vector<2x256xf32>
    %8 = vector.multi_reduction <add>, %7, %cst_2 [2] : vector<2x256x64xf32> to vector<2x256xf32>
    %cst_3 = arith.constant 3.125000e-02 : f32
    %9 = vector.broadcast %cst_3 : f32 to vector<2x256xf32>
    %10 = arith.mulf %8, %9 : vector<2x256xf32>
    %c0_4 = arith.constant 0 : index
    %c0_5 = arith.constant 0 : index
    %11 = vector.load %arg2[%c0_4, %c0_5] : memref<256x128xf32, #tpu.memory_space<vmem>>, vector<256x128xf32>
    %cst_6 = arith.constant dense<0.000000e+00> : vector<2x128xf32>
    %12 = tpu.matmul %10, %11, %cst_6 {dimension_numbers = #tpu.dot_dimension_numbers<[1], [0], [0], [1], [0, 0, 1, 1], [], []>} : vector<2x256xf32>, vector<256x128xf32>, vector<2x128xf32> -> vector<2x128xf32>
    %c0_7 = arith.constant 0 : index
    %c0_8 = arith.constant 0 : index
    %13 = vector.load %arg3[%c0_7, %c0_8] : memref<1x128xf32, #tpu.memory_space<vmem>>, vector<1x128xf32>
    %14 = vector.broadcast %13 : vector<1x128xf32> to vector<2x128xf32>
    %15 = arith.addf %12, %14 : vector<2x128xf32>
    %c0_9 = arith.constant 0 : index
    %c0_10 = arith.constant 0 : index
    %16 = vector.load %arg4[%c0_9, %c0_10] : memref<2x128xf32, #tpu.memory_space<vmem>>, vector<2x128xf32>
    tpu.vector_store %arg4[%c0_9, %c0_10], %15 {strides = array<i32>} : memref<2x128xf32, #tpu.memory_space<vmem>>, vector<2x128xf32>,
    return
  }
  func.func @transform_0(%arg0: i32) -> (i32, i32, i32) {
    %c0_i32 = arith.constant 0 : i32
    %c0_i32_0 = arith.constant 0 : i32
    %c0_i32_1 = arith.constant 0 : i32
    return %arg0, %c0_i32, %c0_i32_0 : i32, i32, i32
  }
  func.func @transform_1(%arg0: i32) -> (i32, i32) {
    %c0_i32 = arith.constant 0 : i32
    %c0_i32_0 = arith.constant 0 : i32
    %c0_i32_1 = arith.constant 0 : i32
    return %c0_i32, %c0_i32_0 : i32, i32
  }
  func.func @transform_2(%arg0: i32) -> (i32, i32) {
    %c0_i32 = arith.constant 0 : i32
    %c0_i32_0 = arith.constant 0 : i32
    %c0_i32_1 = arith.constant 0 : i32
    return %c0_i32, %c0_i32_0 : i32, i32
  }
  func.func @transform_3(%arg0: i32) -> (i32, i32) {
    %c0_i32 = arith.constant 0 : i32
    %c0_i32_0 = arith.constant 0 : i32
    return %arg0, %c0_i32 : i32, i32
  }
}

</mosaic_0001>

<bundles_post_ra>
// kernel: tpu_custom_call.1
= control target key start
LH: loop header
LB: loop body
LE: loop exit
PB: predicated region body
PF: predicated region fallthrough
CT: control target
= control target key end

     0   :  { %v79_v0 = vlaneseq  ;;  %vm148_vm0 = vcmask 523264   ;;  %s1729_s0 = inlined_call_operand.vmem [shape: f32[2,256,64], index: 0, kind: input, shape index: {}]   ;;  %s1730_s1 = inlined_call_operand.vmem [shape: f32[256,128], index: 1, kind: input, shape index: {}]   ;;  %s1731_s2 = inlined_call_operand.vmem [shape: f32[1,128], index: 2, kind: input, shape index: {}]   ;;  %s1732_s3 = inlined_call_operand.hbm [shape: f32[2,128], index: 3, kind: output, shape index: {}]  }
   0x1   :  { %v63_v1 = vld [vmem:[%s1729_s0 + $0x180] sm:$0xff]  ;;  %v64_v4 = vld [vmem:[%s1729_s0 + $0x188] sm:$0xff]  ;;  %v33_v19 = vld [vmem:[%s1729_s0 + $0x90] sm:$0xff] }
   0x2   :  { %v1028_v2 = vand.u32 127, %v79_v0  ;;  %v31_v3 = vld [vmem:[%s1729_s0 + $0x80] sm:$0xff]  ;;  %v32_v5 = vld [vmem:[%s1729_s0 + $0x88] sm:$0xff]  ;;  %v65_v20 = vld [vmem:[%s1729_s0 + $0x190] sm:$0xff] }
   0x3   :  { %v16_v12 = vld [vmem:[%s1729_s0 + $0x8] sm:$0xff]  ;;  %v15_v13 = vld [vmem:[%s1729_s0] sm:$0xff]  ;;  %v34_v25 = vld [vmem:[%s1729_s0 + $0x98] sm:$0xff] }
   0x4   :  { %vm81_vm1 = vcmp.lt.s32.totalorder %v1028_v2, 32  ;;  %v47_v18 = vld [vmem:[%s1729_s0 + $0x100] sm:$0xff]  ;;  %v48_v24 = vld [vmem:[%s1729_s0 + $0x108] sm:$0xff]  ;;  %v17_v26 = vld [vmem:[%s1729_s0 + $0x10] sm:$0xff] }
   0x5   :  { %v132_v6 = vsel %vm81_vm1, %v63_v1, 0.0  ;;  %v100_v7 = vsel %vm81_vm1, %v31_v3, 0.0  ;;  %v133_v8 = vsel %vm81_vm1, %v64_v4, 0.0  ;;  %v101_v9 = vsel %vm81_vm1, %v32_v5, 0.0  ;;  %v66_v28 = vld [vmem:[%s1729_s0 + $0x198] sm:$0xff]  ;;  %v49_v29 = vld [vmem:[%s1729_s0 + $0x110] sm:$0xff] }
   0x6   :  { %v293_v10 = vsel %vm148_vm0, %v132_v6, 0.0  ;;  %v197_v11 = vsel %vm148_vm0, %v100_v7, 0.0  ;;  %v296_v14 = vsel %vm148_vm0, %v133_v8, 0.0  ;;  %v200_v15 = vsel %vm148_vm0, %v101_v9, 0.0  ;;  %v35_v30 = vld [vmem:[%s1729_s0 + $0xa0] sm:$0xff]  ;;  %v18_v32 = vld [vmem:[%s1729_s0 + $0x18] sm:$0xff] }
   0x7   :  { %294 = vadd.xlane.f32.xlu1 %v293_v10  ;;  %198 = vadd.xlane.f32.xlu0 %v197_v11  ;;  %v85_v16 = vsel %vm81_vm1, %v16_v12, 0.0  ;;  %v84_v17 = vsel %vm81_vm1, %v15_v13, 0.0  ;;  %v116_v23 = vsel %vm81_vm1, %v47_v18, 0.0  ;;  %v102_v27 = vsel %vm81_vm1, %v33_v19, 0.0  ;;  %v67_v33 = vld [vmem:[%s1729_s0 + $0x1a0] sm:$0xff]  ;;  %v50_v34 = vld [vmem:[%s1729_s0 + $0x118] sm:$0xff] }
   0x8   :  { %v152_v21 = vsel %vm148_vm0, %v85_v16, 0.0  ;;  %v149_v22 = vsel %vm148_vm0, %v84_v17, 0.0  ;;  %v134_v31 = vsel %vm81_vm1, %v65_v20, 0.0  ;;  %v245_v35 = vsel %vm148_vm0, %v116_v23, 0.0  ;;  %v71_v47 = vld [vmem:[%s1729_s0 + $0x1c0] sm:$0xff]  ;;  %v54_v51 = vld [vmem:[%s1729_s0 + $0x138] sm:$0xff] }
   0x9   :  { %v117_v36 = vsel %vm81_vm1, %v48_v24, 0.0  ;;  %v103_v37 = vsel %vm81_vm1, %v34_v25, 0.0  ;;  %v86_v38 = vsel %vm81_vm1, %v17_v26, 0.0  ;;  %v203_v39 = vsel %vm148_vm0, %v102_v27, 0.0  ;;  %v40_v52 = vld [vmem:[%s1729_s0 + $0xc8] sm:$0xff]  ;;  %v23_v53 = vld [vmem:[%s1729_s0 + $0x40] sm:$0xff] }
   0xa   :  { %v135_v40 = vsel %vm81_vm1, %v66_v28, 0.0  ;;  %v118_v41 = vsel %vm81_vm1, %v49_v29, 0.0  ;;  %v104_v42 = vsel %vm81_vm1, %v35_v30, 0.0  ;;  %v299_v43 = vsel %vm148_vm0, %v134_v31, 0.0  ;;  %v72_v57 = vld [vmem:[%s1729_s0 + $0x1c8] sm:$0xff]  ;;  %v55_v58 = vld [vmem:[%s1729_s0 + $0x140] sm:$0xff] }
   0xb   :  { %297 = vadd.xlane.f32.xlu1 %v296_v14  ;;  %201 = vadd.xlane.f32.xlu0 %v200_v15  ;;  %v87_v44 = vsel %vm81_vm1, %v18_v32, 0.0  ;;  %v136_v45 = vsel %vm81_vm1, %v67_v33, 0.0  ;;  %v119_v46 = vsel %vm81_vm1, %v50_v34, 0.0  ;;  %v248_v48 = vsel %vm148_vm0, %v117_v36, 0.0  ;;  %v41_v59 = vld [vmem:[%s1729_s0 + $0xd0] sm:$0xff]  ;;  %v24_v63 = vld [vmem:[%s1729_s0 + $0x48] sm:$0xff] }
   0xc   :  { %v206_v49 = vsel %vm148_vm0, %v103_v37, 0.0  ;;  %v155_v50 = vsel %vm148_vm0, %v86_v38, 0.0  ;;  %v1143_v54 = vsel %vm148_vm0, %v135_v40, 0.0  ;;  %v1146_v55 = vsel %vm148_vm0, %v118_v41, 0.0  ;;  %v73_v1 = vld [vmem:[%s1729_s0 + $0x1d0] sm:$0xff]  ;;  %v56_v3 = vld [vmem:[%s1729_s0 + $0x148] sm:$0xff] }
   0xd   :  { %v1149_v56 = vsel %vm148_vm0, %v104_v42, 0.0  ;;  %v1161_v60 = vsel %vm148_vm0, %v87_v44, 0.0  ;;  %v1164_v61 = vsel %vm148_vm0, %v136_v45, 0.0  ;;  %v1167_v62 = vsel %vm148_vm0, %v119_v46, 0.0  ;;  %v42_v8 = vld [vmem:[%s1729_s0 + $0xd8] sm:$0xff]  ;;  %v25_v9 = vld [vmem:[%s1729_s0 + $0x50] sm:$0xff] }
   0xe   :  { %v140_v4 = vsel %vm81_vm1, %v71_v47, 0.0  ;;  %v123_v5 = vsel %vm81_vm1, %v54_v51, 0.0  ;;  %v109_v6 = vsel %vm81_vm1, %v40_v52, 0.0  ;;  %v92_v7 = vsel %vm81_vm1, %v23_v53, 0.0  ;;  %v74_v14 = vld [vmem:[%s1729_s0 + $0x1d8] sm:$0xff]  ;;  %v57_v15 = vld [vmem:[%s1729_s0 + $0x150] sm:$0xff] }
   0xf   :  { %153 = vadd.xlane.f32.xlu1 %v152_v21  ;;  %150 = vadd.xlane.f32.xlu0 %v149_v22  ;;  %v1193_v10 = vsel %vm148_vm0, %v140_v4, 0.0  ;;  %v1196_v11 = vsel %vm148_vm0, %v123_v5, 0.0  ;;  %v1199_v12 = vsel %vm148_vm0, %v109_v6, 0.0  ;;  %v1202_v13 = vsel %vm148_vm0, %v92_v7, 0.0  ;;  %v43_v20 = vld [vmem:[%s1729_s0 + $0xe0] sm:$0xff]  ;;  %v26_v21 = vld [vmem:[%s1729_s0 + $0x58] sm:$0xff] }
  0x10   :  { %v141_v16 = vsel %vm81_vm1, %v72_v57, 0.0  ;;  %v124_v17 = vsel %vm81_vm1, %v55_v58, 0.0  ;;  %v110_v18 = vsel %vm81_vm1, %v41_v59, 0.0  ;;  %v93_v19 = vsel %vm81_vm1, %v24_v63, 0.0  ;;  %v75_v26 = vld [vmem:[%s1729_s0 + $0x1e0] sm:$0xff]  ;;  %v58_v27 = vld [vmem:[%s1729_s0 + $0x158] sm:$0xff] }
  0x11   :  { %v1225_v22 = vsel %vm148_vm0, %v141_v16, 0.0  ;;  %v1228_v23 = vsel %vm148_vm0, %v124_v17, 0.0  ;;  %v1231_v24 = vsel %vm148_vm0, %v110_v18, 0.0  ;;  %v1234_v25 = vsel %vm148_vm0, %v93_v19, 0.0  ;;  %v44_v32 = vld [vmem:[%s1729_s0 + $0xe8] sm:$0xff]  ;;  %v27_v33 = vld [vmem:[%s1729_s0 + $0x60] sm:$0xff] }
  0x12   :  { %v142_v28 = vsel %vm81_vm1, %v73_v1, 0.0  ;;  %v125_v29 = vsel %vm81_vm1, %v56_v3, 0.0  ;;  %v111_v30 = vsel %vm81_vm1, %v42_v8, 0.0  ;;  %v94_v31 = vsel %vm81_vm1, %v25_v9, 0.0  ;;  %v76_v38 = vld [vmem:[%s1729_s0 + $0x1e8] sm:$0xff]  ;;  %v45_v44 = vld [vmem:[%s1729_s0 + $0xf0] sm:$0xff] }
  0x13   :  { %246 = vadd.xlane.f32.xlu1 %v245_v35  ;;  %204 = vadd.xlane.f32.xlu0 %v203_v39  ;;  %v1257_v34 = vsel %vm148_vm0, %v142_v28, 0.0  ;;  %v1260_v35 = vsel %vm148_vm0, %v125_v29, 0.0  ;;  %v1263_v36 = vsel %vm148_vm0, %v111_v30, 0.0  ;;  %v1266_v37 = vsel %vm148_vm0, %v94_v31, 0.0  ;;  %v59_v39 = vld [vmem:[%s1729_s0 + $0x160] sm:$0xff]  ;;  %v28_v45 = vld [vmem:[%s1729_s0 + $0x68] sm:$0xff] }
  0x14   :  { %v143_v40 = vsel %vm81_vm1, %v74_v14, 0.0  ;;  %v126_v41 = vsel %vm81_vm1, %v57_v15, 0.0  ;;  %v112_v42 = vsel %vm81_vm1, %v43_v20, 0.0  ;;  %v60_v51 = vld [vmem:[%s1729_s0 + $0x168] sm:$0xff]  ;;  %v144_v52 = vsel %vm81_vm1, %v75_v26, 0.0  ;;  %v46_v59 = vld [vmem:[%s1729_s0 + $0xf8] sm:$0xff] }
  0x15   :  { %v1289_v46 = vsel %vm148_vm0, %v143_v40, 0.0  ;;  %v1292_v47 = vsel %vm148_vm0, %v126_v41, 0.0  ;;  %v127_v53 = vsel %vm81_vm1, %v58_v27, 0.0  ;;  %v113_v57 = vsel %vm81_vm1, %v44_v32, 0.0  ;;  %v29_v63 = vld [vmem:[%s1729_s0 + $0x70] sm:$0xff] }
  0x16   :  { %v96_v58 = vsel %vm81_vm1, %v27_v33, 0.0  ;;  %v1321_v1 = vsel %vm148_vm0, %v144_v52, 0.0  ;;  %v1324_v3 = vsel %vm148_vm0, %v127_v53, 0.0  ;;  %v1327_v4 = vsel %vm148_vm0, %v113_v57, 0.0 }
  0x17   :  { %300 = vadd.xlane.f32.xlu1 %v299_v43  ;;  %249 = vadd.xlane.f32.xlu0 %v248_v48  ;;  %v95_v43 = vsel %vm81_vm1, %v26_v21, 0.0  ;;  %v1295_v48 = vsel %vm148_vm0, %v112_v42, 0.0  ;;  %v1330_v5 = vsel %vm148_vm0, %v96_v58, 0.0 }
  0x1b   :  { %207 = vadd.xlane.f32.xlu1 %v206_v49  ;;  %156 = vadd.xlane.f32.xlu0 %v155_v50  ;;  %v1298_v49 = vsel %vm148_vm0, %v95_v43, 0.0  ;;  %v77_v50 = vld [vmem:[%s1729_s0 + $0x1f0] sm:$0xff] }
  0x1c   :  { %8 = vsyncpa [#allocation3], 0  ;;  %v145_v6 = vsel %vm81_vm1, %v76_v38, 0.0  ;;  %v128_v7 = vsel %vm81_vm1, %v59_v39, 0.0  ;;  %v114_v8 = vsel %vm81_vm1, %v45_v44, 0.0  ;;  %v97_v9 = vsel %vm81_vm1, %v28_v45, 0.0 }
  0x1d   :  { %v78_v14 = vld [vmem:[%s1729_s0 + $0x1f8] sm:$0xff]  ;;  %v1352_v15 = vsel %vm148_vm0, %v128_v7, 0.0  ;;  %v1355_v16 = vsel %vm148_vm0, %v114_v8, 0.0  ;;  %v1358_v17 = vsel %vm148_vm0, %v97_v9, 0.0  ;;  %v146_v20 = vsel %vm81_vm1, %v77_v50, 0.0  ;;  %v36_v28 = vld [vmem:[%s1729_s0 + $0xa8] sm:$0xff] }
  0x1e   :  { %v62_v18 = vld [vmem:[%s1729_s0 + $0x178] sm:$0xff]  ;;  %v129_v21 = vsel %vm81_vm1, %v60_v51, 0.0  ;;  %v115_v26 = vsel %vm81_vm1, %v46_v59, 0.0  ;;  %v98_v27 = vsel %vm81_vm1, %v29_v63, 0.0  ;;  %v19_v29 = vld [vmem:[%s1729_s0 + $0x20] sm:$0xff]  ;;  %v1381_v30 = vsel %vm148_vm0, %v146_v20, 0.0 }
  0x1f   :  { %303 = vadd.xlane.f32.xlu1 %v1143_v54  ;;  %252 = vadd.xlane.f32.xlu0 %v1146_v55  ;;  %v61_v54 = vld [vmem:[%s1729_s0 + $0x170] sm:$0xff]  ;;  %v1349_v55 = vsel %vm148_vm0, %v145_v6, 0.0  ;;  %v30_v19 = vld [vmem:[%s1729_s0 + $0x78] sm:$0xff]  ;;  %v1384_v31 = vsel %vm148_vm0, %v129_v21, 0.0  ;;  %v1387_v32 = vsel %vm148_vm0, %v115_v26, 0.0  ;;  %v1390_v33 = vsel %vm148_vm0, %v98_v27, 0.0 }
  0x20   :  { %v147_v38 = vsel %vm81_vm1, %v78_v14, 0.0  ;;  %v130_v39 = vsel %vm81_vm1, %v61_v54, 0.0  ;;  %v131_v40 = vsel %vm81_vm1, %v62_v18, 0.0  ;;  %v99_v41 = vsel %vm81_vm1, %v30_v19, 0.0  ;;  %v68_v50 = vld [vmem:[%s1729_s0 + $0x1a8] sm:$0xff]  ;;  %v51_v51 = vld [vmem:[%s1729_s0 + $0x120] sm:$0xff] }
  0x21   :  { %v1403_v42 = vsel %vm148_vm0, %v147_v38, 0.0  ;;  %v1406_v43 = vsel %vm148_vm0, %v130_v39, 0.0  ;;  %v105_v44 = vsel %vm81_vm1, %v36_v28, 0.0  ;;  %v88_v45 = vsel %vm81_vm1, %v19_v29, 0.0  ;;  %v37_v59 = vld [vmem:[%s1729_s0 + $0xb0] sm:$0xff]  ;;  %v52_v9 = vld [vmem:[%s1729_s0 + $0x128] sm:$0xff] }
  0x22   :  { %v212_v52 = vsel %vm148_vm0, %v105_v44, 0.0  ;;  %v161_v53 = vsel %vm148_vm0, %v88_v45, 0.0  ;;  %v137_v57 = vsel %vm81_vm1, %v68_v50, 0.0  ;;  %v120_v58 = vsel %vm81_vm1, %v51_v51, 0.0  ;;  %v69_v8 = vld [vmem:[%s1729_s0 + $0x1b0] sm:$0xff]  ;;  %v38_v20 = vld [vmem:[%s1729_s0 + $0xb8] sm:$0xff] }
  0x23   :  { %210 = vadd.xlane.f32.xlu1 %v1149_v56  ;;  %159 = vadd.xlane.f32.xlu0 %v1161_v60  ;;  %v1409_v56 = vsel %vm148_vm0, %v131_v40, 0.0  ;;  %v1412_v60 = vsel %vm148_vm0, %v99_v41, 0.0  ;;  %v257_v63 = vsel %vm148_vm0, %v120_v58, 0.0  ;;  %v106_v6 = vsel %vm81_vm1, %v37_v59, 0.0  ;;  %v21_v21 = vld [vmem:[%s1729_s0 + $0x30] sm:$0xff]  ;;  %v70_v38 = vld [vmem:[%s1729_s0 + $0x1b8] sm:$0xff] }
  0x24   :  { %v215_v14 = vsel %vm148_vm0, %v106_v6, 0.0  ;;  %v138_v18 = vsel %vm81_vm1, %v69_v8, 0.0  ;;  %v121_v19 = vsel %vm81_vm1, %v52_v9, 0.0  ;;  %v107_v28 = vsel %vm81_vm1, %v38_v20, 0.0  ;;  %v53_v39 = vld [vmem:[%s1729_s0 + $0x130] sm:$0xff]  ;;  %v39_v50 = vld [vmem:[%s1729_s0 + $0xc0] sm:$0xff] }
  0x25   :  { %v311_v26 = vsel %vm148_vm0, %v138_v18, 0.0  ;;  %v260_v27 = vsel %vm148_vm0, %v121_v19, 0.0  ;;  %v90_v29 = vsel %vm81_vm1, %v21_v21, 0.0  ;;  %v218_v40 = vsel %vm148_vm0, %v107_v28, 0.0  ;;  %v22_v51 = vld [vmem:[%s1729_s0 + $0x38] sm:$0xff]  ;;  %v422_v6 = vld [vmem:[%s1730_s1 + $0x88] sm:$0xff] }
  0x26   :  { %v167_v41 = vsel %vm148_vm0, %v90_v29, 0.0  ;;  %v139_v44 = vsel %vm81_vm1, %v70_v38, 0.0  ;;  %v122_v45 = vsel %vm81_vm1, %v53_v39, 0.0  ;;  %v91_v58 = vsel %vm81_vm1, %v22_v51, 0.0  ;;  %v405_v20 = vld [vmem:[%s1730_s1] sm:$0xff]  ;;  %s1003_s13 = smov [#allocation2]  }
  0x27   :  { %306 = vadd.xlane.f32.xlu1 %v1164_v61  ;;  %255 = vadd.xlane.f32.xlu0 %v1167_v62  ;;  %v20_v61 = vld [vmem:[%s1729_s0 + $0x28] sm:$0xff]  ;;  %v308_v62 = vsel %vm148_vm0, %v137_v57, 0.0  ;;  %v108_v57 = vsel %vm81_vm1, %v39_v50, 0.0  ;;  %vm517_vm2 = vcmask 130112   ;;  %v519_v29 = vadd.s32 4294967280, %v1028_v2  ;;  %s936_s14 = sshll.u32 %s1003_s13, 4  ;;  %s937_s14 = int_to_ptr.vmem [resolvable:$true] %s936_s14 }
  0x28   :  { %v89_v7 = vsel %vm81_vm1, %v20_v61, 0.0  ;;  %v221_v59 = vsel %vm148_vm0, %v108_v57, 0.0  ;;  %v170_v61 = vsel %vm148_vm0, %v91_v58, 0.0  ;;  %vm524_vm3 = vcmask 195712   ;;  %s981_s15 = scalar_lea.vmem %s937_s14, 32  ;;  %p986_p1 = scmp.lt.s32.totalorder %s937_s14, %s937_s14 }
  0x29   :  { %v164_v54 = vsel %vm148_vm0, %v89_v7, 0.0  ;;  %v406_v7 = vld [vmem:[%s1730_s1 + $0x8] sm:$0xff]  ;;  %vm531_vm4 = vcmask 261312   ;;  %vm538_vm5 = vcmask 326912   ;;  %vm545_vm6 = vcmask 392512   ;;  %p982_p0 = scmp.ne.s32.totalorder %s937_s14, %s981_s15  ;;  %p987_p2 = scmp.lt.s32.totalorder %s981_s15, %s981_s15 }
  0x2a   :  { %vm552_vm7 = vcmask 458112   ;;  %vm559_vm8 = vcmask 523712   ;;  %vm566_vm9 = vcmask 589312   ;;  %vm573_vm10 = vcmask 654912  }
  0x2b   :  { %213 = vadd.xlane.f32.xlu1 %v212_v52  ;;  %162 = vadd.xlane.f32.xlu0 %v161_v53  ;;  %v314_v52 = vsel %vm148_vm0, %v139_v44, 0.0  ;;  %v263_v53 = vsel %vm148_vm0, %v122_v45, 0.0  ;;  %vm580_vm11 = vcmask 720512   ;;  %vm587_vm12 = vcmask 786112   ;;  %p988_p3 = por %p987_p2, %p986_p1 }
  0x2c   :  { %vm594_vm13 = vcmask 851712   ;;  %vm601_vm14 = vcmask 917312   ;;  %vm608_vm15 = vcmask 982912   ;;  %vm615_vm0 = vcmask 1048512  }
  0x2d   :  { %vm854_vm1 = vcmask 1041409   ;;  %p989_p4 = pnand %p988_p3, %p982_p0 }
  0x2f   :  { %309 = vadd.xlane.f32.xlu1 %v308_v62  ;;  %258 = vadd.xlane.f32.xlu0 %v257_v63 }
  0x33   :  { %216 = vadd.xlane.f32.xlu1 %v215_v14  ;;  %165 = vadd.xlane.f32.xlu0 %v164_v54  ;;  %v421_v54 = vld [vmem:[%s1730_s1 + $0x80] sm:$0xff] }
  0x37   :  { %312 = vadd.xlane.f32.xlu1 %v311_v26  ;;  %261 = vadd.xlane.f32.xlu0 %v260_v27 }
  0x3b   :  { %219 = vadd.xlane.f32.xlu1 %v218_v40  ;;  %168 = vadd.xlane.f32.xlu0 %v167_v41 }
  0x3f   :  { %315 = vadd.xlane.f32.xlu1 %v314_v52  ;;  %264 = vadd.xlane.f32.xlu0 %v263_v53 }
  0x43   :  { %222 = vadd.xlane.f32.xlu1 %v221_v59  ;;  %171 = vadd.xlane.f32.xlu0 %v170_v61 }
  0x47   :  { %318 = vadd.xlane.f32.xlu1 %v1193_v10  ;;  %267 = vadd.xlane.f32.xlu0 %v1196_v11  ;;  %v436_v10 = vld [vmem:[%s1730_s1 + $0xf8] sm:$0xff] }
  0x48   :  { %v420_v11 = vld [vmem:[%s1730_s1 + $0x78] sm:$0xff]  ;;  %945 = vmatprep.subr.mxu0 %v436_v10 }
  0x49   :  { %946 = vmatpush3.msra.mxu0 %v420_v11 }
  0x4b   :  { %225 = vadd.xlane.f32.xlu1 %v1199_v12  ;;  %174 = vadd.xlane.f32.xlu0 %v1202_v13  ;;  %v435_v12 = vld [vmem:[%s1730_s1 + $0xf0] sm:$0xff] }
  0x4c   :  { %v419_v13 = vld [vmem:[%s1730_s1 + $0x70] sm:$0xff]  ;;  %947 = vmatprep.subr.mxu0 %v435_v12  ;;  %v526_v12 = vadd.s32 4294967272, %v1028_v2 }
  0x4d   :  { %948 = vmatpush3.msra.mxu0 %v419_v13 }
  0x4f   :  { %321 = vadd.xlane.f32.xlu1 %v1225_v22  ;;  %270 = vadd.xlane.f32.xlu0 %v1228_v23  ;;  %v434_v22 = vld [vmem:[%s1730_s1 + $0xe8] sm:$0xff] }
  0x50   :  { %v418_v23 = vld [vmem:[%s1730_s1 + $0x68] sm:$0xff]  ;;  %949 = vmatprep.subr.mxu0 %v434_v22 }
  0x51   :  { %950 = vmatpush3.msra.mxu0 %v418_v23 }
  0x53   :  { %228 = vadd.xlane.f32.xlu1 %v1231_v24  ;;  %177 = vadd.xlane.f32.xlu0 %v1234_v25  ;;  %v433_v24 = vld [vmem:[%s1730_s1 + $0xe0] sm:$0xff] }
  0x54   :  { %v417_v25 = vld [vmem:[%s1730_s1 + $0x60] sm:$0xff]  ;;  %951 = vmatprep.subr.mxu0 %v433_v24 }
  0x55   :  { %952 = vmatpush3.msra.mxu0 %v417_v25 }
  0x57   :  { %324 = vadd.xlane.f32.xlu1 %v1257_v34  ;;  %273 = vadd.xlane.f32.xlu0 %v1260_v35  ;;  %v432_v34 = vld [vmem:[%s1730_s1 + $0xd8] sm:$0xff] }
  0x58   :  { %v416_v35 = vld [vmem:[%s1730_s1 + $0x58] sm:$0xff]  ;;  %953 = vmatprep.subr.mxu0 %v432_v34 }
  0x59   :  { %954 = vmatpush3.msra.mxu0 %v416_v35 }
  0x5b   :  { %231 = vadd.xlane.f32.xlu1 %v1263_v36  ;;  %180 = vadd.xlane.f32.xlu0 %v1266_v37  ;;  %v431_v36 = vld [vmem:[%s1730_s1 + $0xd0] sm:$0xff] }
  0x5c   :  { %v415_v37 = vld [vmem:[%s1730_s1 + $0x50] sm:$0xff]  ;;  %955 = vmatprep.subr.mxu0 %v431_v36 }
  0x5d   :  { %956 = vmatpush3.msra.mxu0 %v415_v37 }
  0x5f   :  { %327 = vadd.xlane.f32.xlu1 %v1289_v46  ;;  %276 = vadd.xlane.f32.xlu0 %v1292_v47  ;;  %v430_v46 = vld [vmem:[%s1730_s1 + $0xc8] sm:$0xff] }
  0x60   :  { %v414_v47 = vld [vmem:[%s1730_s1 + $0x48] sm:$0xff]  ;;  %957 = vmatprep.subr.mxu0 %v430_v46 }
  0x61   :  { %958 = vmatpush3.msra.mxu0 %v414_v47 }
  0x63   :  { %234 = vadd.xlane.f32.xlu1 %v1295_v48  ;;  %183 = vadd.xlane.f32.xlu0 %v1298_v49  ;;  %v429_v48 = vld [vmem:[%s1730_s1 + $0xc0] sm:$0xff] }
  0x64   :  { %v413_v49 = vld [vmem:[%s1730_s1 + $0x40] sm:$0xff]  ;;  %959 = vmatprep.subr.mxu0 %v429_v48 }
  0x65   :  { %960 = vmatpush3.msra.mxu0 %v413_v49 }
  0x67   :  { %330 = vadd.xlane.f32.xlu1 %v1321_v1  ;;  %279 = vadd.xlane.f32.xlu0 %v1324_v3  ;;  %v428_v1 = vld [vmem:[%s1730_s1 + $0xb8] sm:$0xff] }
  0x68   :  { %v412_v3 = vld [vmem:[%s1730_s1 + $0x38] sm:$0xff]  ;;  %961 = vmatprep.subr.mxu0 %v428_v1 }
  0x69   :  { %962 = vmatpush3.msra.mxu0 %v412_v3 }
  0x6b   :  { %237 = vadd.xlane.f32.xlu1 %v1327_v4  ;;  %186 = vadd.xlane.f32.xlu0 %v1330_v5  ;;  %v427_v4 = vld [vmem:[%s1730_s1 + $0xb0] sm:$0xff] }
  0x6c   :  { %v411_v5 = vld [vmem:[%s1730_s1 + $0x30] sm:$0xff]  ;;  %963 = vmatprep.subr.mxu0 %v427_v4 }
  0x6d   :  { %964 = vmatpush3.msra.mxu0 %v411_v5  ;;  %v533_v5 = vadd.s32 4294967264, %v1028_v2 }
  0x6f   :  { %333 = vadd.xlane.f32.xlu1 %v1349_v55  ;;  %282 = vadd.xlane.f32.xlu0 %v1352_v15  ;;  %v426_v55 = vld [vmem:[%s1730_s1 + $0xa8] sm:$0xff] }
  0x70   :  { %v410_v15 = vld [vmem:[%s1730_s1 + $0x28] sm:$0xff]  ;;  %965 = vmatprep.subr.mxu0 %v426_v55 }
  0x71   :  { %966 = vmatpush3.msra.mxu0 %v410_v15 }
  0x73   :  { %240 = vadd.xlane.f32.xlu1 %v1355_v16  ;;  %189 = vadd.xlane.f32.xlu0 %v1358_v17  ;;  %v1593_v16 = vshrl.u32 %v79_v0, 7  ;;  %v425_v17 = vld [vmem:[%s1730_s1 + $0xa0] sm:$0xff]  ;;  %v408_v0 = vld [vmem:[%s1730_s1 + $0x18] sm:$0xff] }
  0x74   :  { %967 = vmatprep.subr.mxu0 %v425_v17 }
  0x75   :  { %v522_v52 = vsub.s32 %v519_v29, %v1593_v16  ;;  %v529_v36 = vsub.s32 %v526_v12, %v1593_v16 }
  0x77   :  { %336 = vadd.xlane.f32.xlu1 %v1381_v30  ;;  %285 = vadd.xlane.f32.xlu0 %v1384_v31  ;;  %v409_v30 = vld [vmem:[%s1730_s1 + $0x20] sm:$0xff]  ;;  %v424_v31 = vld [vmem:[%s1730_s1 + $0x98] sm:$0xff] }
  0x78   :  { %968 = vmatpush3.msra.mxu0 %v409_v30 }
  0x79   :  { %969 = vmatprep.subr.mxu0 %v424_v31 }
  0x7a   :  { %970 = vmatpush3.msra.mxu0 %v408_v0 }
  0x7b   :  { %243 = vadd.xlane.f32.xlu1 %v1387_v32  ;;  %192 = vadd.xlane.f32.xlu0 %v1390_v33  ;;  %v1609_v32 = vsub.s32 %v1028_v2, %v1593_v16  ;;  %v512_v33 = vadd.s32 4294967288, %v1028_v2 }
  0x7d   :  { %v515_v14 = vsub.s32 %v512_v33, %v1593_v16 }
  0x7f   :  { %339 = vadd.xlane.f32.xlu1 %v1403_v42  ;;  %288 = vadd.xlane.f32.xlu0 %v1406_v43  ;;  %v423_v42 = vld [vmem:[%s1730_s1 + $0x90] sm:$0xff] }
  0x80   :  { %971 = vmatprep.subr.mxu0 %v423_v42  ;;  %v536_v42 = vsub.s32 %v533_v5, %v1593_v16 }
  0x83   :  { %291 = vadd.xlane.f32.xlu1 %v1409_v56  ;;  %195 = vadd.xlane.f32.xlu0 %v1412_v60  ;;  %v407_v60 = vld [vmem:[%s1730_s1 + $0x10] sm:$0xff] }
  0x84   :  { %972 = vmatpush3.msra.mxu0 %v407_v60 }
  0x85   :  { %973 = vmatprep.subr.mxu0 %v422_v6 }
  0x86   :  { %974 = vmatpush3.msra.mxu0 %v406_v7 }
  0x87   :  { %975 = vmatprep.subr.mxu0 %v421_v54 }
  0x88   :  { %976 = vmatpush3.msra.mxu0 %v405_v20 }
  0x90   :  { %v295_v43 = vpop.xlane.xlu1 %294  ;;  %v199_v56 = vpop.xlane.xlu0 %198 }
  0x91   :  { %v389_v62 = vmul.f32 0.03125, %v295_v43  ;;  %v357_v63 = vmul.f32 0.03125, %v199_v56 }
  0x93   :  { %v778_v8 = vrot.slane %v389_v62, %v1609_v32  ;;  %v620_v9 = vrot.slane %v357_v63, %v1609_v32 }
  0x94   :  { %v298_v18 = vpop.xlane.xlu1 %297  ;;  %v202_v19 = vpop.xlane.xlu0 %201 }
  0x95   :  { %v390_v21 = vmul.f32 0.03125, %v298_v18  ;;  %v358_v26 = vmul.f32 0.03125, %v202_v19 }
  0x97   :  { %v782_v27 = vrot.slane %v390_v21, %v515_v14  ;;  %v624_v28 = vrot.slane %v358_v26, %v515_v14 }
  0x98   :  { %v154_v38 = vpop.xlane.xlu1 %153  ;;  %v151_v39 = vpop.xlane.xlu0 %150 }
  0x99   :  { %v783_v40 = vsel %vm517_vm2, %v782_v27, %v778_v8  ;;  %v625_v41 = vsel %vm517_vm2, %v624_v28, %v620_v9  ;;  %v342_v44 = vmul.f32 0.03125, %v154_v38  ;;  %v341_v45 = vmul.f32 0.03125, %v151_v39 }
  0x9a   :  { %v540_v9 = vadd.s32 4294967256, %v1028_v2 }
  0x9b   :  { %v516_v50 = vrot.slane %v342_v44, %v515_v14  ;;  %v511_v51 = vrot.slane %v341_v45, %v1609_v32 }
  0x9c   :  { %v247_v53 = vpop.xlane.xlu1 %246  ;;  %v205_v57 = vpop.xlane.xlu0 %204  ;;  %v543_v28 = vsub.s32 %v540_v9, %v1593_v16 }
  0x9d   :  { %v518_v58 = vsel %vm517_vm2, %v516_v50, %v511_v51  ;;  %v373_v59 = vmul.f32 0.03125, %v247_v53  ;;  %v359_v61 = vmul.f32 0.03125, %v205_v57  ;;  %v547_v51 = vadd.s32 4294967248, %v1028_v2 }
  0x9f   :  { %v699_v10 = vrot.slane %v373_v59, %v1609_v32  ;;  %v629_v11 = vrot.slane %v359_v61, %v522_v52  ;;  %v550_v12 = vsub.s32 %v547_v51, %v1593_v16 }
  0xa0   :  { %v301_v13 = vpop.xlane.xlu1 %300  ;;  %v250_v22 = vpop.xlane.xlu0 %249 }
  0xa1   :  { %v630_v23 = vsel %vm524_vm3, %v629_v11, %v625_v41  ;;  %v391_v24 = vmul.f32 0.03125, %v301_v13  ;;  %v374_v25 = vmul.f32 0.03125, %v250_v22 }
  0xa3   :  { %v787_v34 = vrot.slane %v391_v24, %v522_v52  ;;  %v703_v35 = vrot.slane %v374_v25, %v515_v14 }
  0xa4   :  { %v208_v37 = vpop.xlane.xlu1 %207  ;;  %v157_v46 = vpop.xlane.xlu0 %156 }
  0xa5   :  { %v788_v47 = vsel %vm524_vm3, %v787_v34, %v783_v40  ;;  %v704_v48 = vsel %vm517_vm2, %v703_v35, %v699_v10  ;;  %v360_v49 = vmul.f32 0.03125, %v208_v37  ;;  %v343_v1 = vmul.f32 0.03125, %v157_v46 }
  0xa6   :  { %v554_v37 = vadd.s32 4294967240, %v1028_v2 }
  0xa7   :  { %v634_v3 = vrot.slane %v360_v49, %v529_v36  ;;  %v523_v4 = vrot.slane %v343_v1, %v522_v52 }
  0xa8   :  { %v304_v55 = vpop.xlane.xlu1 %303  ;;  %v253_v15 = vpop.xlane.xlu0 %252 }
  0xa9   :  { %v635_v17 = vsel %vm531_vm4, %v634_v3, %v630_v23  ;;  %v525_v30 = vsel %vm524_vm3, %v523_v4, %v518_v58  ;;  %v392_v31 = vmul.f32 0.03125, %v304_v55  ;;  %v375_v0 = vmul.f32 0.03125, %v253_v15 }
  0xaa   :  { %v557_v55 = vsub.s32 %v554_v37, %v1593_v16 }
  0xab   :  { %v792_v32 = vrot.slane %v392_v31, %v529_v36  ;;  %v708_v33 = vrot.slane %v375_v0, %v522_v52 }
  0xac   :  { %v211_v43 = vpop.xlane.xlu1 %210  ;;  %v160_v56 = vpop.xlane.xlu0 %159 }
  0xad   :  { %v793_v60 = vsel %vm531_vm4, %v792_v32, %v788_v47  ;;  %v709_v62 = vsel %vm524_vm3, %v708_v33, %v704_v48  ;;  %v361_v63 = vmul.f32 0.03125, %v211_v43  ;;  %v344_v6 = vmul.f32 0.03125, %v160_v56 }
  0xae   :  { %v561_v43 = vadd.s32 4294967232, %v1028_v2 }
  0xaf   :  { %v639_v7 = vrot.slane %v361_v63, %v536_v42  ;;  %v530_v8 = vrot.slane %v344_v6, %v529_v36 }
  0xb0   :  { %v307_v14 = vpop.xlane.xlu1 %306  ;;  %v256_v54 = vpop.xlane.xlu0 %255 }
  0xb1   :  { %v640_v18 = vsel %vm538_vm5, %v639_v7, %v635_v17  ;;  %v532_v19 = vsel %vm531_vm4, %v530_v8, %v525_v30  ;;  %v393_v20 = vmul.f32 0.03125, %v307_v14  ;;  %v376_v21 = vmul.f32 0.03125, %v256_v54 }
  0xb2   :  { %v564_v14 = vsub.s32 %v561_v43, %v1593_v16 }
  0xb3   :  { %v797_v26 = vrot.slane %v393_v20, %v536_v42  ;;  %v713_v27 = vrot.slane %v376_v21, %v529_v36 }
  0xb4   :  { %v214_v29 = vpop.xlane.xlu1 %213  ;;  %v163_v38 = vpop.xlane.xlu0 %162 }
  0xb5   :  { %v798_v39 = vsel %vm538_vm5, %v797_v26, %v793_v60  ;;  %v714_v40 = vsel %vm531_vm4, %v713_v27, %v709_v62  ;;  %v362_v41 = vmul.f32 0.03125, %v214_v29  ;;  %v345_v44 = vmul.f32 0.03125, %v163_v38 }
  0xb6   :  { %v568_v29 = vadd.s32 4294967224, %v1028_v2 }
  0xb7   :  { %v644_v45 = vrot.slane %v362_v41, %v543_v28  ;;  %v537_v50 = vrot.slane %v345_v44, %v536_v42 }
  0xb8   :  { %v310_v52 = vpop.xlane.xlu1 %309  ;;  %v259_v53 = vpop.xlane.xlu0 %258 }
  0xb9   :  { %v645_v57 = vsel %vm545_vm6, %v644_v45, %v640_v18  ;;  %v539_v58 = vsel %vm538_vm5, %v537_v50, %v532_v19  ;;  %v394_v59 = vmul.f32 0.03125, %v310_v52  ;;  %v377_v61 = vmul.f32 0.03125, %v259_v53 }
  0xba   :  { %v571_v52 = vsub.s32 %v568_v29, %v1593_v16 }
  0xbb   :  { %v802_v10 = vrot.slane %v394_v59, %v543_v28  ;;  %v718_v11 = vrot.slane %v377_v61, %v536_v42 }
  0xbc   :  { %v217_v13 = vpop.xlane.xlu1 %216  ;;  %v166_v22 = vpop.xlane.xlu0 %165 }
  0xbd   :  { %v803_v23 = vsel %vm545_vm6, %v802_v10, %v798_v39  ;;  %v719_v24 = vsel %vm538_vm5, %v718_v11, %v714_v40  ;;  %v363_v25 = vmul.f32 0.03125, %v217_v13  ;;  %v346_v34 = vmul.f32 0.03125, %v166_v22 }
  0xbe   :  { %v575_v13 = vadd.s32 4294967216, %v1028_v2 }
  0xbf   :  { %v649_v35 = vrot.slane %v363_v25, %v550_v12  ;;  %v544_v36 = vrot.slane %v346_v34, %v543_v28 }
  0xc0   :  { %v313_v46 = vpop.xlane.xlu1 %312  ;;  %v262_v47 = vpop.xlane.xlu0 %261 }
  0xc1   :  { %v650_v48 = vsel %vm552_vm7, %v649_v35, %v645_v57  ;;  %v546_v49 = vsel %vm545_vm6, %v544_v36, %v539_v58  ;;  %v395_v1 = vmul.f32 0.03125, %v313_v46  ;;  %v378_v3 = vmul.f32 0.03125, %v262_v47 }
  0xc2   :  { %v578_v46 = vsub.s32 %v575_v13, %v1593_v16 }
  0xc3   :  { %v807_v4 = vrot.slane %v395_v1, %v550_v12  ;;  %v723_v5 = vrot.slane %v378_v3, %v543_v28 }
  0xc4   :  { %v220_v15 = vpop.xlane.xlu1 %219  ;;  %v169_v17 = vpop.xlane.xlu0 %168 }
  0xc5   :  { %v808_v30 = vsel %vm552_vm7, %v807_v4, %v803_v23  ;;  %v724_v31 = vsel %vm545_vm6, %v723_v5, %v719_v24  ;;  %v364_v0 = vmul.f32 0.03125, %v220_v15  ;;  %v347_v32 = vmul.f32 0.03125, %v169_v17 }
  0xc6   :  { %v582_v15 = vadd.s32 4294967208, %v1028_v2 }
  0xc7   :  { %v654_v33 = vrot.slane %v364_v0, %v557_v55  ;;  %v551_v42 = vrot.slane %v347_v32, %v550_v12 }
  0xc8   :  { %v316_v56 = vpop.xlane.xlu1 %315  ;;  %v265_v60 = vpop.xlane.xlu0 %264 }
  0xc9   :  { %v655_v62 = vsel %vm559_vm8, %v654_v33, %v650_v48  ;;  %v553_v63 = vsel %vm552_vm7, %v551_v42, %v546_v49  ;;  %v396_v6 = vmul.f32 0.03125, %v316_v56  ;;  %v379_v7 = vmul.f32 0.03125, %v265_v60 }
  0xca   :  { %v585_v56 = vsub.s32 %v582_v15, %v1593_v16 }
  0xcb   :  { %v812_v8 = vrot.slane %v396_v6, %v557_v55  ;;  %v728_v9 = vrot.slane %v379_v7, %v550_v12 }
  0xcc   :  { %v223_v54 = vpop.xlane.xlu1 %222  ;;  %v172_v18 = vpop.xlane.xlu0 %171 }
  0xcd   :  { %v813_v19 = vsel %vm559_vm8, %v812_v8, %v808_v30  ;;  %v729_v20 = vsel %vm552_vm7, %v728_v9, %v724_v31  ;;  %v365_v21 = vmul.f32 0.03125, %v223_v54  ;;  %v348_v26 = vmul.f32 0.03125, %v172_v18 }
  0xce   :  { %v589_v54 = vadd.s32 4294967200, %v1028_v2 }
  0xcf   :  { %v659_v27 = vrot.slane %v365_v21, %v564_v14  ;;  %v558_v28 = vrot.slane %v348_v26, %v557_v55 }
  0xd0   :  { %v319_v38 = vpop.xlane.xlu1 %318  ;;  %v268_v39 = vpop.xlane.xlu0 %267 }
  0xd1   :  { %v660_v40 = vsel %vm566_vm9, %v659_v27, %v655_v62  ;;  %v560_v41 = vsel %vm559_vm8, %v558_v28, %v553_v63  ;;  %v397_v44 = vmul.f32 0.03125, %v319_v38  ;;  %v380_v45 = vmul.f32 0.03125, %v268_v39 }
  0xd2   :  { %v592_v38 = vsub.s32 %v589_v54, %v1593_v16 }
  0xd3   :  { %v817_v50 = vrot.slane %v397_v44, %v564_v14  ;;  %v733_v51 = vrot.slane %v380_v45, %v557_v55 }
  0xd4   :  { %v226_v53 = vpop.xlane.xlu1 %225  ;;  %v175_v57 = vpop.xlane.xlu0 %174 }
  0xd5   :  { %v818_v58 = vsel %vm566_vm9, %v817_v50, %v813_v19  ;;  %v734_v59 = vsel %vm559_vm8, %v733_v51, %v729_v20  ;;  %v366_v61 = vmul.f32 0.03125, %v226_v53  ;;  %v349_v10 = vmul.f32 0.03125, %v175_v57 }
  0xd6   :  { %v596_v53 = vadd.s32 4294967192, %v1028_v2 }
  0xd7   :  { %v664_v11 = vrot.slane %v366_v61, %v571_v52  ;;  %v565_v12 = vrot.slane %v349_v10, %v564_v14 }
  0xd8   :  { %v322_v22 = vpop.xlane.xlu1 %321  ;;  %v271_v23 = vpop.xlane.xlu0 %270 }
  0xd9   :  { %v665_v24 = vsel %vm573_vm10, %v664_v11, %v660_v40  ;;  %v567_v25 = vsel %vm566_vm9, %v565_v12, %v560_v41  ;;  %v398_v34 = vmul.f32 0.03125, %v322_v22  ;;  %v381_v35 = vmul.f32 0.03125, %v271_v23 }
  0xda   :  { %v599_v22 = vsub.s32 %v596_v53, %v1593_v16 }
  0xdb   :  { %v822_v36 = vrot.slane %v398_v34, %v571_v52  ;;  %v738_v37 = vrot.slane %v381_v35, %v564_v14 }
  0xdc   :  { %v229_v47 = vpop.xlane.xlu1 %228  ;;  %v178_v48 = vpop.xlane.xlu0 %177 }
  0xdd   :  { %v823_v49 = vsel %vm573_vm10, %v822_v36, %v818_v58  ;;  %v739_v1 = vsel %vm566_vm9, %v738_v37, %v734_v59  ;;  %v367_v3 = vmul.f32 0.03125, %v229_v47  ;;  %v350_v4 = vmul.f32 0.03125, %v178_v48 }
  0xde   :  { %v603_v47 = vadd.s32 4294967184, %v1028_v2 }
  0xdf   :  { %v669_v5 = vrot.slane %v367_v3, %v578_v46  ;;  %v572_v55 = vrot.slane %v350_v4, %v571_v52 }
  0xe0   :  { %v325_v17 = vpop.xlane.xlu1 %324  ;;  %v274_v30 = vpop.xlane.xlu0 %273 }
  0xe1   :  { %v670_v31 = vsel %vm580_vm11, %v669_v5, %v665_v24  ;;  %v574_v0 = vsel %vm573_vm10, %v572_v55, %v567_v25  ;;  %v399_v32 = vmul.f32 0.03125, %v325_v17  ;;  %v382_v33 = vmul.f32 0.03125, %v274_v30 }
  0xe2   :  { %v606_v17 = vsub.s32 %v603_v47, %v1593_v16 }
  0xe3   :  { %v827_v42 = vrot.slane %v399_v32, %v578_v46  ;;  %v743_v43 = vrot.slane %v382_v33, %v571_v52 }
  0xe4   :  { %v232_v60 = vpop.xlane.xlu1 %231  ;;  %v181_v62 = vpop.xlane.xlu0 %180 }
  0xe5   :  { %v828_v63 = vsel %vm580_vm11, %v827_v42, %v823_v49  ;;  %v744_v6 = vsel %vm573_vm10, %v743_v43, %v739_v1  ;;  %v368_v7 = vmul.f32 0.03125, %v232_v60  ;;  %v351_v8 = vmul.f32 0.03125, %v181_v62 }
  0xe6   :  { %v610_v60 = vadd.s32 4294967176, %v1028_v2 }
  0xe7   :  { %v674_v9 = vrot.slane %v368_v7, %v585_v56  ;;  %v579_v14 = vrot.slane %v351_v8, %v578_v46 }
  0xe8   :  { %v328_v18 = vpop.xlane.xlu1 %327  ;;  %v277_v19 = vpop.xlane.xlu0 %276 }
  0xe9   :  { %v675_v20 = vsel %vm587_vm12, %v674_v9, %v670_v31  ;;  %v581_v21 = vsel %vm580_vm11, %v579_v14, %v574_v0  ;;  %v400_v26 = vmul.f32 0.03125, %v328_v18  ;;  %v383_v27 = vmul.f32 0.03125, %v277_v19 }
  0xea   :  { %v613_v18 = vsub.s32 %v610_v60, %v1593_v16 }
  0xeb   :  { %v832_v28 = vrot.slane %v400_v26, %v585_v56  ;;  %v748_v29 = vrot.slane %v383_v27, %v578_v46 }
  0xec   :  { %v235_v39 = vpop.xlane.xlu1 %234  ;;  %v184_v40 = vpop.xlane.xlu0 %183 }
  0xed   :  { %v833_v41 = vsel %vm587_vm12, %v832_v28, %v828_v63  ;;  %v749_v44 = vsel %vm580_vm11, %v748_v29, %v744_v6  ;;  %v369_v45 = vmul.f32 0.03125, %v235_v39  ;;  %v352_v50 = vmul.f32 0.03125, %v184_v40 }
  0xef   :  { %v679_v51 = vrot.slane %v369_v45, %v592_v38  ;;  %v586_v52 = vrot.slane %v352_v50, %v585_v56 }
  0xf0   :  { %v331_v57 = vpop.xlane.xlu1 %330  ;;  %v280_v58 = vpop.xlane.xlu0 %279 }
  0xf1   :  { %v680_v59 = vsel %vm594_vm13, %v679_v51, %v675_v20  ;;  %v588_v61 = vsel %vm587_vm12, %v586_v52, %v581_v21  ;;  %v401_v10 = vmul.f32 0.03125, %v331_v57  ;;  %v384_v11 = vmul.f32 0.03125, %v280_v58 }
  0xf3   :  { %v837_v12 = vrot.slane %v401_v10, %v592_v38  ;;  %v753_v13 = vrot.slane %v384_v11, %v585_v56 }
  0xf4   :  { %v238_v23 = vpop.xlane.xlu1 %237  ;;  %v187_v24 = vpop.xlane.xlu0 %186 }
  0xf5   :  { %v838_v25 = vsel %vm594_vm13, %v837_v12, %v833_v41  ;;  %v754_v34 = vsel %vm587_vm12, %v753_v13, %v749_v44  ;;  %v370_v35 = vmul.f32 0.03125, %v238_v23  ;;  %v353_v36 = vmul.f32 0.03125, %v187_v24 }
  0xf7   :  { %v684_v37 = vrot.slane %v370_v35, %v599_v22  ;;  %v593_v46 = vrot.slane %v353_v36, %v592_v38 }
  0xf8   :  { %v334_v48 = vpop.xlane.xlu1 %333  ;;  %v283_v49 = vpop.xlane.xlu0 %282 }
  0xf9   :  { %v595_v1 = vsel %vm594_vm13, %v593_v46, %v588_v61  ;;  %v402_v3 = vmul.f32 0.03125, %v334_v48  ;;  %v385_v4 = vmul.f32 0.03125, %v283_v49  ;;  %v685_v5 = vsel %vm601_vm14, %v684_v37, %v680_v59 }
  0xfb   :  { %v842_v55 = vrot.slane %v402_v3, %v599_v22  ;;  %v758_v15 = vrot.slane %v385_v4, %v592_v38 }
  0xfc   :  { %v241_v30 = vpop.xlane.xlu1 %240  ;;  %v190_v31 = vpop.xlane.xlu0 %189 }
  0xfd   :  { %v759_v0 = vsel %vm594_vm13, %v758_v15, %v754_v34  ;;  %v371_v32 = vmul.f32 0.03125, %v241_v30  ;;  %v354_v33 = vmul.f32 0.03125, %v190_v31  ;;  %v843_v42 = vsel %vm601_vm14, %v842_v55, %v838_v25  ;;  %v944_v25 = vld [vmem:[%s1731_s2] ss:$0 sm:$0xff] }
  0xff   :  { %v689_v43 = vrot.slane %v371_v32, %v606_v17  ;;  %v600_v56 = vrot.slane %v354_v33, %v599_v22 }
 0x100   :  { %v337_v62 = vpop.xlane.xlu1 %336  ;;  %v286_v63 = vpop.xlane.xlu0 %285 }
 0x101   :  { %v602_v6 = vsel %vm601_vm14, %v600_v56, %v595_v1  ;;  %v403_v7 = vmul.f32 0.03125, %v337_v62  ;;  %v386_v8 = vmul.f32 0.03125, %v286_v63  ;;  %v690_v9 = vsel %vm608_vm15, %v689_v43, %v685_v5 }
 0x103   :  { %v847_v14 = vrot.slane %v403_v7, %v606_v17  ;;  %v763_v54 = vrot.slane %v386_v8, %v599_v22 }
 0x104   :  { %v244_v19 = vpop.xlane.xlu1 %243  ;;  %v193_v20 = vpop.xlane.xlu0 %192 }
 0x105   :  { %v764_v21 = vsel %vm601_vm14, %v763_v54, %v759_v0  ;;  %v372_v26 = vmul.f32 0.03125, %v244_v19  ;;  %v355_v27 = vmul.f32 0.03125, %v193_v20  ;;  %v848_v2 = vsel %vm608_vm15, %v847_v14, %v843_v42 }
 0x107   :  { %v694_v28 = vrot.slane %v372_v26, %v613_v18  ;;  %v607_v29 = vrot.slane %v355_v27, %v606_v17 }
 0x108   :  { %v340_v38 = vpop.xlane.xlu1 %339  ;;  %v289_v39 = vpop.xlane.xlu0 %288 }
 0x109   :  { %v404_v40 = vmul.f32 0.03125, %v340_v38  ;;  %v387_v41 = vmul.f32 0.03125, %v289_v39  ;;  %v695_v44 = vsel %vm615_vm0, %v694_v28, %v690_v9  ;;  %v609_v45 = vsel %vm608_vm15, %v607_v29, %v602_v6 }
 0x10b   :  { %v852_v16 = vrot.slane %v404_v40, %v613_v18  ;;  %v768_v50 = vrot.slane %v387_v41, %v606_v17 }
 0x10c   :  { %v292_v51 = vpop.xlane.xlu1 %291  ;;  %v196_v52 = vpop.xlane.xlu0 %195 }
 0x10d   :  { %v388_v53 = vmul.f32 0.03125, %v292_v51  ;;  %v356_v57 = vmul.f32 0.03125, %v196_v52  ;;  %v853_v58 = vsel %vm615_vm0, %v852_v16, %v848_v2  ;;  %v769_v59 = vsel %vm608_vm15, %v768_v50, %v764_v21 }
 0x10e   :  { %v856_v61 = vsel %vm854_vm1, %v853_v58, %v695_v44 }
 0x10f   :  { %v773_v10 = vrot.slane %v388_v53, %v613_v18  ;;  %v614_v11 = vrot.slane %v356_v57, %v613_v18  ;;  %923 = vmatprep.mubr.f32.mxu0 %v856_v61 }
 0x111   :  { %v616_v12 = vsel %vm615_vm0, %v614_v11, %v609_v45  ;;  %v774_v13 = vsel %vm615_vm0, %v773_v10, %v769_v59 }
 0x112   :  { %v855_v22 = vsel %vm854_vm1, %v774_v13, %v616_v12 }
 0x113   :  { %924 = vmatmul.mubr.f32.vlgmr.msra.gmra.mxu0 %v855_v22 }
 0x1d3   :  { %v977_v23 = vpop.f32.mrf.mxu0 }
 0x1d5   :  { %v978_v24 = vpop.f32.mrf.mxu0 }
 0x1d6   :  { %v979_v34 = vadd.f32 %v978_v24, %v977_v23 }
 0x1d8   :  { %v926_v35 = vadd.f32 %v979_v34, %v944_v25 }
 0x1da   :  { %929 = vst [vmem:[#allocation2] sm:$0x3] %v926_v35 }
 0x1db   :  { %992 = shalt.err (!%p989_p4)
}
 0x1dc   :  { %939 = dma.vmem_to_hbm [thread:$0]  %s937_s14, 32, %s1732_s3, [#allocation3]  }
 0x1dd   :  { %1001 = dma.done.wait [#allocation3], 32  }
 0x1de   :  { %1002 = vsyncadd [#allocation3], 4294967264 }
 0x1df   :  { %943 = vsyncpa [#allocation3], 1 }

</bundles_post_ra>
